<compile_context>
chip_gen: v7x
topology: tpu7x:2x2x1
jax: 0.10.0
libtpu: 0.0.40
codegen_flags: <defaults>
</compile_context>

<pallas_src>
import functools

import jax
import jax.numpy as jnp
from jax.experimental import pallas as pl
from jax.experimental.pallas import tpu as pltpu


def _round_up(n, m):
    return (n + m - 1) // m * m


# ----------------------------------------------------------------------------
# Kernel
# ----------------------------------------------------------------------------
def _mlp_kernel(x_ref, name_ref, w1_ref, ep_ref, w2_ref, b2_ref, w3_ref, b3_ref,
                o_ref):
    x = x_ref[...].astype(jnp.bfloat16)              # [TB, F]   (cast in-kernel)
    nm = name_ref[...]                               # [TB, 1]   int32
    tb = x.shape[0]
    n_names = ep_ref.shape[0]

    # One-hot gather of the folded (embedding @ W1_emb + b1) bias on the MXU,
    # kept in f32 so b1 is applied at full precision.
    iota = jax.lax.broadcasted_iota(jnp.int32, (tb, n_names), 1)
    onehot = (nm == iota).astype(jnp.float32)        # [TB, num_names] exact 0/1

    # fc1 (x-part) + per-name folded bias + ReLU
    h1 = jnp.dot(x, w1_ref[...], preferred_element_type=jnp.float32)
    h1 = h1 + jnp.dot(onehot, ep_ref[...], preferred_element_type=jnp.float32)
    h1 = jnp.maximum(h1, 0.0)                        # [TB, 64] f32

    # fc2 + ReLU
    h2 = jnp.dot(h1.astype(jnp.bfloat16), w2_ref[...],
                 preferred_element_type=jnp.float32)
    h2 = jnp.maximum(h2 + b2_ref[...], 0.0)          # [TB, 32] f32

    # out + Sigmoid (f32 epilogue, exact-width store)
    z = jnp.dot(h2.astype(jnp.bfloat16), w3_ref[...],
                preferred_element_type=jnp.float32)
    o_ref[...] = jax.nn.sigmoid(z + b3_ref[...])     # [TB, 15] f32


# ----------------------------------------------------------------------------
# One-time parameter folding (call once, cache the result)
# ----------------------------------------------------------------------------
def fold_params(params):
    """Fold embedding+b1 into a per-name bias table; cast MXU weights to bf16."""
    emb, w1, b1 = params["emb"], params["w1"], params["b1"]
    emb_dim = emb.shape[1]
    num_features = w1.shape[0] - emb_dim

    w1x = w1[:num_features, :]                       # [F, 64]  (x-part of fc1)
    emb_proj = emb @ w1[num_features:, :] + b1       # [num_names, 64]  f32

    return {
        "w1x": w1x.astype(jnp.bfloat16),
        "emb_proj": emb_proj.astype(jnp.float32),    # keep f32 (carries b1)
        "w2": params["w2"].astype(jnp.bfloat16),
        "b2": params["b2"].astype(jnp.float32),
        "w3": params["w3"].astype(jnp.bfloat16),
        "b3": params["b3"].astype(jnp.float32),
    }


# ----------------------------------------------------------------------------
# Forward wrapper
# ----------------------------------------------------------------------------
def pair_model_forward(x, name, folded, *, block_b=2048):
    """x: [B, num_features] f32, name: [B] int -> [B, 15] f32 probabilities."""
    w1x, ep = folded["w1x"], folded["emb_proj"]
    w2, b2 = folded["w2"], folded["b2"]
    w3, b3 = folded["w3"], folded["b3"]

    B, F = x.shape
    out_dim = w3.shape[1]
    name2 = name.reshape(B, 1).astype(jnp.int32)     # tiny reshape only

    # Batch tile: large (default 2048, multiple of 16), but capped so the grid
    # has >= 2 steps when possible (v7x: both TensorCores get work).
    TB = max(16, min(_round_up(block_b, 16), _round_up(pl.cdiv(B, 2), 16)))
    grid = (pl.cdiv(B, TB),)                         # ragged last block is fine

    const = lambda shape: pl.BlockSpec(shape, lambda i: (0, 0))  # VMEM-resident

    # NOTE: packing 8 batch rows per 128-lane output row (review item 4) was
    # skipped: with the exact-width (B, 15) output the writeback is already
    # smaller than the input read stream, and it avoids an in-kernel relayout.
    out = pl.pallas_call(
        _mlp_kernel,
        out_shape=jax.ShapeDtypeStruct((B, out_dim), jnp.float32),
        grid_spec=pltpu.PrefetchScalarGridSpec(
            num_scalar_prefetch=0,
            grid=grid,
            in_specs=[
                pl.BlockSpec((TB, F), lambda i: (i, 0)),   # x tile (streamed, f32)
                pl.BlockSpec((TB, 1), lambda i: (i, 0)),   # name tile (streamed)
                const(w1x.shape),                          # [F, 64]       bf16
                const(ep.shape),                           # [num_names,64] f32
                const(w2.shape),                           # [64, 32]      bf16
                const(b2.shape),                           # [1, 32]       f32
                const(w3.shape),                           # [32, 15]      bf16
                const(b3.shape),                           # [1, 15]       f32
            ],
            out_specs=pl.BlockSpec((TB, out_dim), lambda i: (i, 0)),
        ),
        compiler_params=pltpu.CompilerParams(
            dimension_semantics=("parallel",),             # megacore-shardable
        ),
    )(x, name2, w1x, ep, w2, b2, w3, b3)
    return out


# ----------------------------------------------------------------------------
# Reference + test harness
# ----------------------------------------------------------------------------
def init_params(key, num_features, num_names, emb_dim=8):
    ks = jax.random.split(key, 7)
    f_in = num_features + emb_dim
    return {
        "emb": jax.random.normal(ks[0], (num_names, emb_dim), jnp.float32),
        "w1": jax.random.normal(ks[1], (f_in, 64), jnp.float32) * 0.1,
        "b1": jax.random.normal(ks[2], (1, 64), jnp.float32) * 0.1,
        "w2": jax.random.normal(ks[3], (64, 32), jnp.float32) * 0.1,
        "b2": jax.random.normal(ks[4], (1, 32), jnp.float32) * 0.1,
        "w3": jax.random.normal(ks[5], (32, 15), jnp.float32) * 0.1,
        "b3": jax.random.normal(ks[6], (1, 15), jnp.float32) * 0.1,
    }


def reference_forward(x, name, params):
    """Pure-JAX f32 reference of the PyTorch forward."""
    e = jnp.take(params["emb"], name, axis=0)
    h = jnp.concatenate([x, e], axis=1)
    h = jnp.maximum(h @ params["w1"] + params["b1"], 0.0)
    h = jnp.maximum(h @ params["w2"] + params["b2"], 0.0)
    return jax.nn.sigmoid(h @ params["w3"] + params["b3"])


if __name__ == "__main__":
    num_features, num_names, emb_dim = 24, 16, 8

    key = jax.random.PRNGKey(0)
    kx, kn, kp = jax.random.split(key, 3)
    params = init_params(kp, num_features, num_names, emb_dim)
    folded = fold_params(params)                       # one-time, cached

    fwd = jax.jit(pair_model_forward, static_argnames=("block_b",))

    # Case 1: small batch, single grid step.
    B = 8
    x = jax.random.normal(kx, (B, num_features), jnp.float32)
    name = jax.random.randint(kn, (B,), 0, num_names, jnp.int32)
    out = jax.block_until_ready(fwd(x, name, folded))
    ref = reference_forward(x, name, params)
    assert out.shape == (B, 15)
    # bf16 MXU operands -> loosened tolerance vs the f32 reference.
    assert jnp.allclose(out, ref, atol=2e-2, rtol=2e-2)

    # Case 2: ragged batch + multi-step grid (partial last block path).
    B2 = 40
    x2 = jax.random.normal(jax.random.PRNGKey(1), (B2, num_features), jnp.float32)
    name2 = jax.random.randint(jax.random.PRNGKey(2), (B2,), 0, num_names, jnp.int32)
    out2 = jax.block_until_ready(fwd(x2, name2, folded, block_b=16))
    ref2 = reference_forward(x2, name2, params)
    assert out2.shape == (B2, 15)
    assert jnp.allclose(out2, ref2, atol=2e-2, rtol=2e-2)

    print("KERNEL_OK")
</pallas_src>

<mosaic_0001>
module attributes {stable_mosaic.version = 11 : i64} {
  func.func @_mlp_kernel(%arg0: i32, %arg1: memref<16x24xf32, #tpu.memory_space<vmem>>, %arg2: memref<16x1xi32, #tpu.memory_space<vmem>>, %arg3: memref<24x64xbf16, #tpu.memory_space<vmem>>, %arg4: memref<16x64xf32, #tpu.memory_space<vmem>>, %arg5: memref<64x32xbf16, #tpu.memory_space<vmem>>, %arg6: memref<1x32xf32, #tpu.memory_space<vmem>>, %arg7: memref<32x15xbf16, #tpu.memory_space<vmem>>, %arg8: memref<1x15xf32, #tpu.memory_space<vmem>>, %arg9: memref<16x15xf32, #tpu.memory_space<vmem>>) attributes {dimension_semantics = [#tpu.dimension_semantics<parallel>], iteration_bounds = array<i64: 1>, scalar_prefetch = 0 : i64, scratch_operands = 0 : i64, tpu.core_type = #tpu.core_type<tc>, window_params = [{transform_indices = @transform_0, window_bounds = array<i64: 16, 24>}, {transform_indices = @transform_1, window_bounds = array<i64: 16, 1>}, {pipeline_mode = #tpu.pipeline_mode<synchronous>, transform_indices = @transform_2, window_bounds = array<i64: 24, 64>}, {pipeline_mode = #tpu.pipeline_mode<synchronous>, transform_indices = @transform_3, window_bounds = array<i64: 16, 64>}, {pipeline_mode = #tpu.pipeline_mode<synchronous>, transform_indices = @transform_4, window_bounds = array<i64: 64, 32>}, {pipeline_mode = #tpu.pipeline_mode<synchronous>, transform_indices = @transform_5, window_bounds = array<i64: 1, 32>}, {pipeline_mode = #tpu.pipeline_mode<synchronous>, transform_indices = @transform_6, window_bounds = array<i64: 32, 15>}, {pipeline_mode = #tpu.pipeline_mode<synchronous>, transform_indices = @transform_7, window_bounds = array<i64: 1, 15>}, {transform_indices = @transform_8, window_bounds = array<i64: 16, 15>}]} {
    %c0 = arith.constant 0 : index
    %c0_0 = arith.constant 0 : index
    %0 = vector.load %arg1[%c0, %c0_0] : memref<16x24xf32, #tpu.memory_space<vmem>>, vector<16x24xf32>
    %1 = arith.truncf %0 : vector<16x24xf32> to vector<16x24xbf16>
    %c0_1 = arith.constant 0 : index
    %c0_2 = arith.constant 0 : index
    %2 = vector.load %arg2[%c0_1, %c0_2] : memref<16x1xi32, #tpu.memory_space<vmem>>, vector<16x1xi32>
    %3 = tpu.iota {dimensions = array<i32: 1>} : vector<16x16xi32>
    %4 = vector.broadcast %2 : vector<16x1xi32> to vector<16x16xi32>
    %5 = arith.cmpi eq, %4, %3 : vector<16x16xi32>
    %6 = arith.extui %5 : vector<16x16xi1> to vector<16x16xi32>
    %7 = arith.sitofp %6 : vector<16x16xi32> to vector<16x16xf32>
    %c0_3 = arith.constant 0 : index
    %c0_4 = arith.constant 0 : index
    %8 = vector.load %arg3[%c0_3, %c0_4] : memref<24x64xbf16, #tpu.memory_space<vmem>>, vector<24x64xbf16>
    %cst = arith.constant dense<0.000000e+00> : vector<16x64xf32>
    %9 = tpu.matmul %1, %8, %cst {dimension_numbers = #tpu.dot_dimension_numbers<[1], [0], [0], [1], [0, 0, 1, 1], [], []>} : vector<16x24xbf16>, vector<24x64xbf16>, vector<16x64xf32> -> vector<16x64xf32>
    %c0_5 = arith.constant 0 : index
    %c0_6 = arith.constant 0 : index
    %10 = vector.load %arg4[%c0_5, %c0_6] : memref<16x64xf32, #tpu.memory_space<vmem>>, vector<16x64xf32>
    %cst_7 = arith.constant dense<0.000000e+00> : vector<16x64xf32>
    %11 = tpu.matmul %7, %10, %cst_7 {dimension_numbers = #tpu.dot_dimension_numbers<[1], [0], [0], [1], [0, 0, 1, 1], [], []>} : vector<16x16xf32>, vector<16x64xf32>, vector<16x64xf32> -> vector<16x64xf32>
    %12 = arith.addf %9, %11 : vector<16x64xf32>
    %cst_8 = arith.constant 0.000000e+00 : f32
    %13 = vector.broadcast %cst_8 : f32 to vector<16x64xf32>
    %14 = arith.maximumf %12, %13 : vector<16x64xf32>
    %15 = arith.truncf %14 : vector<16x64xf32> to vector<16x64xbf16>
    %c0_9 = arith.constant 0 : index
    %c0_10 = arith.constant 0 : index
    %16 = vector.load %arg5[%c0_9, %c0_10] : memref<64x32xbf16, #tpu.memory_space<vmem>>, vector<64x32xbf16>
    %cst_11 = arith.constant dense<0.000000e+00> : vector<16x32xf32>
    %17 = tpu.matmul %15, %16, %cst_11 {dimension_numbers = #tpu.dot_dimension_numbers<[1], [0], [0], [1], [0, 0, 1, 1], [], []>} : vector<16x64xbf16>, vector<64x32xbf16>, vector<16x32xf32> -> vector<16x32xf32>
    %c0_12 = arith.constant 0 : index
    %c0_13 = arith.constant 0 : index
    %18 = vector.load %arg6[%c0_12, %c0_13] : memref<1x32xf32, #tpu.memory_space<vmem>>, vector<1x32xf32>
    %19 = vector.broadcast %18 : vector<1x32xf32> to vector<16x32xf32>
    %20 = arith.addf %17, %19 : vector<16x32xf32>
    %cst_14 = arith.constant 0.000000e+00 : f32
    %21 = vector.broadcast %cst_14 : f32 to vector<16x32xf32>
    %22 = arith.maximumf %20, %21 : vector<16x32xf32>
    %23 = arith.truncf %22 : vector<16x32xf32> to vector<16x32xbf16>
    %c0_15 = arith.constant 0 : index
    %c0_16 = arith.constant 0 : index
    %24 = vector.load %arg7[%c0_15, %c0_16] : memref<32x15xbf16, #tpu.memory_space<vmem>>, vector<32x15xbf16>
    %cst_17 = arith.constant dense<0.000000e+00> : vector<16x15xf32>
    %25 = tpu.matmul %23, %24, %cst_17 {dimension_numbers = #tpu.dot_dimension_numbers<[1], [0], [0], [1], [0, 0, 1, 1], [], []>} : vector<16x32xbf16>, vector<32x15xbf16>, vector<16x15xf32> -> vector<16x15xf32>
    %c0_18 = arith.constant 0 : index
    %c0_19 = arith.constant 0 : index
    %26 = vector.load %arg8[%c0_18, %c0_19] : memref<1x15xf32, #tpu.memory_space<vmem>>, vector<1x15xf32>
    %27 = vector.broadcast %26 : vector<1x15xf32> to vector<16x15xf32>
    %28 = arith.addf %25, %27 : vector<16x15xf32>
    %29 = arith.negf %28 : vector<16x15xf32>
    %30 = math.exp %29 : vector<16x15xf32>
    %cst_20 = arith.constant 1.000000e+00 : f32
    %31 = vector.broadcast %cst_20 : f32 to vector<16x15xf32>
    %32 = arith.addf %31, %30 : vector<16x15xf32>
    %33 = arith.divf %31, %32 : vector<16x15xf32>
    %c0_21 = arith.constant 0 : index
    %c0_22 = arith.constant 0 : index
    %34 = vector.load %arg9[%c0_21, %c0_22] : memref<16x15xf32, #tpu.memory_space<vmem>>, vector<16x15xf32>
    tpu.vector_store %arg9[%c0_21, %c0_22], %33 {strides = array<i32>} : memref<16x15xf32, #tpu.memory_space<vmem>>, vector<16x15xf32>,
    return
  }
  func.func @transform_0(%arg0: i32) -> (i32, i32) {
    %c0_i32 = arith.constant 0 : i32
    %c0_i32_0 = arith.constant 0 : i32
    return %arg0, %c0_i32 : i32, i32
  }
  func.func @transform_1(%arg0: i32) -> (i32, i32) {
    %c0_i32 = arith.constant 0 : i32
    %c0_i32_0 = arith.constant 0 : i32
    return %arg0, %c0_i32 : i32, i32
  }
  func.func @transform_2(%arg0: i32) -> (i32, i32) {
    %c0_i32 = arith.constant 0 : i32
    %c0_i32_0 = arith.constant 0 : i32
    %c0_i32_1 = arith.constant 0 : i32
    return %c0_i32, %c0_i32_0 : i32, i32
  }
  func.func @transform_3(%arg0: i32) -> (i32, i32) {
    %c0_i32 = arith.constant 0 : i32
    %c0_i32_0 = arith.constant 0 : i32
    %c0_i32_1 = arith.constant 0 : i32
    return %c0_i32, %c0_i32_0 : i32, i32
  }
  func.func @transform_4(%arg0: i32) -> (i32, i32) {
    %c0_i32 = arith.constant 0 : i32
    %c0_i32_0 = arith.constant 0 : i32
    %c0_i32_1 = arith.constant 0 : i32
    return %c0_i32, %c0_i32_0 : i32, i32
  }
  func.func @transform_5(%arg0: i32) -> (i32, i32) {
    %c0_i32 = arith.constant 0 : i32
    %c0_i32_0 = arith.constant 0 : i32
    %c0_i32_1 = arith.constant 0 : i32
    return %c0_i32, %c0_i32_0 : i32, i32
  }
  func.func @transform_6(%arg0: i32) -> (i32, i32) {
    %c0_i32 = arith.constant 0 : i32
    %c0_i32_0 = arith.constant 0 : i32
    %c0_i32_1 = arith.constant 0 : i32
    return %c0_i32, %c0_i32_0 : i32, i32
  }
  func.func @transform_7(%arg0: i32) -> (i32, i32) {
    %c0_i32 = arith.constant 0 : i32
    %c0_i32_0 = arith.constant 0 : i32
    %c0_i32_1 = arith.constant 0 : i32
    return %c0_i32, %c0_i32_0 : i32, i32
  }
  func.func @transform_8(%arg0: i32) -> (i32, i32) {
    %c0_i32 = arith.constant 0 : i32
    %c0_i32_0 = arith.constant 0 : i32
    return %arg0, %c0_i32 : i32, i32
  }
}

</mosaic_0001>

<bundles_post_ra>
// kernel: pair_model_forward.1
= control target key start
LH: loop header
LB: loop body
LE: loop exit
PB: predicated region body
PF: predicated region fallthrough
CT: control target
= control target key end

     0   :  { %v504_v1 = vmov 0   ;;  %v505_v2 = vmov 0.0   ;;  %vm150_vm0 = vcmask 1043456   ;;  %s631_s0 = inlined_call_operand.vmem [shape: f32[8,24], index: 0, kind: input, shape index: {}]   ;;  %s632_s1 = inlined_call_operand.vmem [shape: s32[8,1], index: 1, kind: input, shape index: {}]   ;;  %s633_s2 = inlined_call_operand.vmem [shape: bf16[24,64], index: 2, kind: input, shape index: {}]   ;;  %s634_s3 = inlined_call_operand.vmem [shape: f32[16,64], index: 3, kind: input, shape index: {}]   ;;  %s635_s4 = inlined_call_operand.vmem [shape: bf16[64,32], index: 4, kind: input, shape index: {}]   ;;  %s636_s5 = inlined_call_operand.vmem [shape: f32[1,32], index: 5, kind: input, shape index: {}]   ;;  %s637_s6 = inlined_call_operand.vmem [shape: bf16[32,15], index: 6, kind: input, shape index: {}]   ;;  %s638_s7 = inlined_call_operand.vmem [shape: f32[1,15], index: 7, kind: input, shape index: {}]   ;;  %s639_s8 = inlined_call_operand.hbm [shape: f32[8,15], index: 8, kind: output, shape index: {}]  }
   0x1   :  { %v34_v0 = vld [vmem:[%s632_s1] sm:$0xff]  ;;  %463 = vset.pattern.permute.xlu0 %v504_v1  ;;  %425 = vmatprep.subr.bf16.mxu1 %v505_v2  ;;  %v35_v4 = vld [vmem:[%s632_s1 + $0x8] sm:$0xff] }
   0x2   :  { %v464_v3 = vld [vmem:[%s633_s2] sm:$0xff]   ;;  %39 = vperm.xlu0 %463, %v34_v0   ;;  %v465_v5 = vld [vmem:[%s633_s2 + $0x8] ss:$0 sps:$4 sm:$0xff]  }
   0x3   :  { %13 = vsyncpa [#allocation3], 0  ;;  %426 = vmatpush3.bf16.msra.mxu1 %v464_v3  ;;  %vm506_vm1 = vmmov 0   ;;  %v53_v6 = vld [vmem:[%s634_s3] sm:$0xff]  ;;  %v54_v7 = vld [vmem:[%s634_s3 + $0x8] sm:$0xff]  ;;  %vm146_vm2 = vcmask 195584   ;;  %v36_v13 = vlaneseq }
   0x4   :  { %429 = vmatprep.mubr.msk.bf16.mxu1 %vm506_vm1, %v505_v2  ;;  %v31_v8 = vld [vmem:[%s631_s0] sm:$0xff]  ;;  %427 = vmatprep.subr.bf16.mxu1 %v505_v2  ;;  %v152_v9 = vsel %vm150_vm0, %v465_v5, 0  ;;  %v453_v10 = vpack.c.bf16 %v54_v7, %v53_v6  ;;  %v32_v11 = vld [vmem:[%s631_s0 + $0x8] sm:$0xff]  ;;  %vm55_vm3 = vcmask 130048   ;;  %v468_v21 = vld [vmem:[%s635_s4 + $0x10] sm:$0xff]   ;;  %vm237_vm6 = vcmask 523264  }
   0x5   :  { %v33_v12 = vpack.c.bf16 %v32_v11, %v31_v8  ;;  %v37_v14 = vand.u32 127, %v36_v13  ;;  %v466_v18 = vld [vmem:[%s635_s4] sm:$0xff]   ;;  %v467_v20 = vld [vmem:[%s635_s4 + $0x8] sm:$0xff]   ;;  %v469_v24 = vld [vmem:[%s635_s4 + $0x18] sm:$0xff]   ;;  %vm308_vm7 = vcmask 261120   ;;  %vm365_vm8 = vcmask 121856  }
   0x6   :  { %42 = vperm.xlu0 %463, %v35_v4   ;;  %454 = vmatprep.subr.bf16.mxu0 %v453_v10  ;;  %v470_v34 = vld [vmem:[%s637_s6] sm:$0xff]   ;;  %v471_v35 = vld [vmem:[%s637_s6 + $0x8] sm:$0xff]  }
   0x7   :  { %428 = vmatpush3.bf16.msra.mxu1 %v152_v9  ;;  %456 = vmatpush3.bf16.msra.mxu0 %v453_v10  ;;  %v391_v36 = vld [vmem:[%s636_s5] ss:$0 sm:$0xff] }
   0x8   :  { %433 = vmatprep.subr.bf16.mxu0 %v505_v2  ;;  %445 = vmatprep.subr.bf16.mxu1 %v505_v2  ;;  %v397_v46 = vld [vmem:[%s638_s7] ss:$0 sm:$0xff] }
   0xa   :  { %430 = vmatmul.mubr.msk.bf16.vlgmr.msra.gmra.mrb[0].mxu1 %vm146_vm2, %v33_v12 }
   0xb   :  { %449 = vmatprep.mubr.msk.bf16.mxu1 %vm506_vm1, %v505_v2  ;;  %446 = vmatpush3.bf16.msra.mxu1 %v470_v34 }
   0xc   :  { %447 = vmatprep.subr.bf16.mxu1 %v505_v2 }
   0xf   :  { %448 = vmatpush3.bf16.msra.mxu1 %v471_v35 }
  0x81   :  { %v40_v15 = vpop.permute.xlu0 %39 }
  0x82   :  { %vm44_vm4 = vcmp.eq.s32.totalorder %v40_v15, %v37_v14 }
  0x83   :  { %v384_v16 = vsel %vm44_vm4, 1.0, %v505_v2 }
  0x84   :  { %422 = vmatprep.mubr.msk.f32.mxu0 %vm55_vm3, %v384_v16 }
  0x85   :  { %v43_v17 = vpop.permute.xlu0 %42 }
  0x86   :  { %vm45_vm5 = vcmp.eq.s32.totalorder %v43_v17, %v37_v14 }
  0x87   :  { %v385_v19 = vsel %vm45_vm5, 1.0, %v505_v2 }
  0x88   :  { %423 = vmatmul.mubr.msk.f32.vlgmr.msra.gmra.mrb[0].mxu0 %vm55_vm3, %v385_v19 }
  0x89   :  { %434 = vmatpush3.bf16.msra.mxu0 %v466_v18  ;;  %441 = vmatprep.mubr.msk.bf16.mxu0 %vm506_vm1, %v505_v2 }
  0x8a   :  { %435 = vmatprep.subr.bf16.mxu0 %v505_v2 }
  0x8d   :  { %436 = vmatpush3.bf16.msra.mxu0 %v467_v20 }
  0x8e   :  { %437 = vmatprep.subr.bf16.mxu0 %v505_v2 }
  0x91   :  { %438 = vmatpush3.bf16.msra.mxu0 %v468_v21 }
  0x92   :  { %439 = vmatprep.subr.bf16.mxu0 %v505_v2 }
  0x95   :  { %440 = vmatpush3.bf16.msra.mxu0 %v469_v24 }
  0xdd   :  { %v188_v22 = vpop.f32.mrb[0].mxu1 }
  0xde   :  { %v431_v23 = vpop.f32.mrb[1].mxu1 }
  0xdf   :  { %v191_v25 = vpop.f32.mrb[2].mxu1 }
  0xe0   :  { %v432_v26 = vpop.f32.mrb[3].mxu1 }
 0x15b   :  { %v424_v27 = vpop.f32.mrb[0].mxu0 }
 0x15c   :  { %v192_v28 = vadd.f32 %v424_v27, %v191_v25  ;;  %v128_v29 = vpop.f32.mrb[1].mxu0 }
 0x15d   :  { %v189_v30 = vadd.f32 %v188_v22, %v128_v29 }
 0x15e   :  { %v196_v31 = vmax.f32 %v192_v28, 0.0 }
 0x15f   :  { %v195_v32 = vmax.f32 %v189_v30, 0.0 }
 0x161   :  { %v197_v33 = vpack.c.bf16 %v196_v31, %v195_v32 }
 0x163   :  { %442 = vmatmul.mubr.msk.bf16.vlgmr.msra.gmra.mrb[4].mxu0 %vm237_vm6, %v197_v33 }
 0x236   :  { %v275_v37 = vpop.f32.mrb[4].mxu0 }
 0x237   :  { %v276_v38 = vadd.f32 %v391_v36, %v275_v37  ;;  %v443_v39 = vpop.f32.mrb[5].mxu0 }
 0x238   :  { %v278_v40 = vpop.f32.mrb[6].mxu0 }
 0x239   :  { %v279_v41 = vadd.f32 %v391_v36, %v278_v40  ;;  %v444_v42 = vpop.f32.mrb[7].mxu0  ;;  %v282_v43 = vmax.f32 %v276_v38, 0.0 }
 0x23b   :  { %v283_v44 = vmax.f32 %v279_v41, 0.0 }
 0x23d   :  { %v284_v45 = vpack.c.bf16 %v283_v44, %v282_v43 }
 0x23f   :  { %450 = vmatmul.mubr.msk.bf16.vlgmr.msra.gmra.mrb[4].mxu1 %vm308_vm7, %v284_v45 }
 0x312   :  { %v346_v47 = vpop.f32.mrb[4].mxu1 }
 0x313   :  { %v347_v48 = vadd.f32 %v397_v46, %v346_v47  ;;  %v451_v49 = vpop.f32.mrb[5].mxu1 }
 0x314   :  { %v349_v50 = vpop.f32.mrb[6].mxu1 }
 0x315   :  { %v401_v51 = vmul.f32 -1.442695, %v347_v48  ;;  %v350_v52 = vadd.f32 %v397_v46, %v349_v50  ;;  %v452_v53 = vpop.f32.mrb[7].mxu1 }
 0x317   :  { %472 = vpow2.f32 %v401_v51  ;;  %v402_v54 = vmul.f32 -1.442695, %v350_v52 }
 0x319   :  { %474 = vpow2.f32 %v402_v54 }
 0x321   :  { %v473_v55 = vpop.eup %472 }
 0x322   :  { %v359_v56 = vadd.f32 1.0, %v473_v55 }
 0x323   :  { %v475_v57 = vpop.eup %474 }
 0x324   :  { %476 = vrcp.f32 %v359_v56  ;;  %v360_v58 = vadd.f32 1.0, %v475_v57 }
 0x326   :  { %478 = vrcp.f32 %v360_v58 }
 0x32e   :  { %v477_v59 = vpop.eup %476 }
 0x32f   :  { %366 = vst.msk [vmem:[#allocation2] sm:$0xff] %vm365_vm8, %v477_v59 }
 0x330   :  { %v479_v60 = vpop.eup %478 }
 0x331   :  { %367 = vst.msk [vmem:[#allocation2 + $0x8] sm:$0xff] %vm365_vm8, %v479_v60 }
 0x332   :  { %372 = vsyncadd [#allocation3], 128  ;;  %s507_s5 = smov [#allocation2]  }
 0x333   :  { %s373_s6 = sshll.u32 %s507_s5, 4  ;;  %s374_s6 = int_to_ptr.vmem [resolvable:$true] %s373_s6 }
 0x334   :  { %s480_s7 = scalar_lea.vmem %s374_s6, 128  ;;  %s484_s10 = scalar_lea.vmem %s374_s6, 256 }
 0x335   :  { %p481_p0 = scmp.ne.s32.totalorder %s374_s6, %s480_s7  ;;  %p485_p1 = scmp.lt.s32.totalorder %s374_s6, %s374_s6 }
 0x336   :  { %p486_p2 = scmp.lt.s32.totalorder %s484_s10, %s480_s7 }
 0x338   :  { %p487_p3 = por %p486_p2, %p485_p1 }
 0x33a   :  { %p488_p4 = pnand %p487_p3, %p481_p0 }
 0x33c   :  { %491 = shalt.err (!%p488_p4)
}
 0x33d   :  { %s492_s13 = scalar_lea.hbm %s639_s8, 128 }
 0x33e   :  { %p493_p5 = scmp.ne.s32.totalorder %s639_s8, %s492_s13  ;;  %p496_p6 = scmp.lt.u32.totalorder %s492_s13, %s639_s8 }
 0x340   :  { %p498_p7 = pnand %p496_p6, %p493_p5 }
 0x342   :  { %501 = shalt.err (!%p498_p7)
}
 0x343   :  { %s508_s1 = smov 128   ;;  %s509_s2 = smov 8  }
 0x344   :  { %379 = dma.vmem_to_hbm [thread:$0]  %s374_s6, 128, %s639_s8, [#allocation3], %s508_s1, %s508_s1, %s509_s2  }
 0x345   :  { %502 = dma.done.wait [#allocation3], 256  }
 0x346   :  { %503 = vsyncadd [#allocation3], 4294967040 }
 0x347   :  { %383 = vsyncpa [#allocation3], 1 }

</bundles_post_ra>
